<compile_context>
chip_gen: v7x
topology: tpu7x:2x2x1
jax: 0.10.0
libtpu: 0.0.40
codegen_flags: <defaults>
</compile_context>

<pallas_src>
import jax
import jax.numpy as jnp
from jax import lax
from jax.experimental import pallas as pl
from jax.experimental.pallas import tpu as pltpu


# ----------------------------------------------------------------------------
# Pallas kernel: fused (im2col-matmul + bias).
#   a_ref: (tm, K)   bf16   im2col activation tile (M = N*H*W rows)
#   w_ref: (K, tco)  bf16   weight tile (stationary across the M axis)
#   b_ref: (1, tco)  f32    bias tile
#   o_ref: (tm, tco) f32/bf16  output tile (single dense, lane-full store)
# ----------------------------------------------------------------------------
def _matmul_bias_kernel(a_ref, w_ref, b_ref, o_ref):
    acc = jnp.dot(a_ref[...], w_ref[...], preferred_element_type=jnp.float32)
    o_ref[...] = (acc + b_ref[...]).astype(o_ref.dtype)


def _choose_tm(m):
    # Largest M tile (<= 256) that divides M; fall back to the full extent
    # (full-extent blocks are always legal regardless of the (8,128) rule).
    for tm in (256, 128, 64, 32, 16, 8):
        if m % tm == 0:
            return tm
    return m


def _matmul_bias_pallas(a, w, b, out_dtype):
    """a: (M, K) bf16, w: (K, Cout) bf16 (Cout padded to x128), b: (1, Cout) f32."""
    M, K = a.shape
    Cout = w.shape[1]
    # 128-wide Cout tiles: even 2-TC split on v7x (768/128 = 6 -> 3+3), native
    # v5e MXU width, and a small (1.8 MiB bf16) weight tile for deep pipelining.
    tco = 128 if Cout % 128 == 0 else Cout
    tm = _choose_tm(M)
    grid = (Cout // tco, M // tm)   # Cout outer, M inner -> weight-stationary

    return pl.pallas_call(
        _matmul_bias_kernel,
        out_shape=jax.ShapeDtypeStruct((M, Cout), out_dtype),
        grid_spec=pltpu.PrefetchScalarGridSpec(
            num_scalar_prefetch=0,
            grid=grid,
            in_specs=[
                pl.BlockSpec((tm, K), lambda j, i: (i, 0)),     # activations
                pl.BlockSpec((K, tco), lambda j, i: (0, j)),    # weights (constant over i)
                pl.BlockSpec((1, tco), lambda j, i: (0, j)),    # bias
            ],
            out_specs=pl.BlockSpec((tm, tco), lambda j, i: (i, j)),
        ),
        compiler_params=pltpu.CompilerParams(
            dimension_semantics=("parallel", "parallel")),
    )(a, w, b)


# ----------------------------------------------------------------------------
# 3x3 stride-1 pad-1 convolution, NHWC. The (tiny) im2col is done in the
# wrapper; the Pallas kernel issues one MXU matmul per (M, Cout) tile.
# ----------------------------------------------------------------------------
def conv3x3_same_nhwc(x, w_kc, b_1c, cout, out_dtype=jnp.float32):
    """x: (N,H,W,Cin) any float, w_kc: (9*Cin, Cout_pad) bf16, b_1c: (1, Cout_pad) f32.

    `cout` is the true (unpadded) output channel count; padded lanes are sliced off.
    """
    N, H, W, Cin = x.shape
    K, Cout_pad = w_kc.shape
    assert K == 9 * Cin
    xp = jnp.pad(x.astype(jnp.bfloat16), ((0, 0), (1, 1), (1, 1), (0, 0)))
    # tap order (kh, kw, cin) matches the HWIO weight reshape in _prep_conv.
    cols = jnp.concatenate(
        [xp[:, kh:kh + H, kw:kw + W, :] for kh in range(3) for kw in range(3)],
        axis=-1)                                          # (N, H, W, 9*Cin)
    a = cols.reshape(N * H * W, K)
    out = _matmul_bias_pallas(a, w_kc, b_1c, out_dtype)   # (N*H*W, Cout_pad)
    out = out.reshape(N, H, W, Cout_pad)
    if cout != Cout_pad:
        out = out[..., :cout]
    return out


# ----------------------------------------------------------------------------
# Parameter preparation (done once, outside jit): im2col weight layout, bf16,
# output channels zero-padded up to a multiple of 128 for lane-dense stores.
# ----------------------------------------------------------------------------
def _convT_as_conv_weight(wt):
    # ConvTranspose2d(stride=1, padding=1) == Conv2d(pad=1) with the
    # (in<->out)-transposed, spatially flipped kernel.
    return jnp.transpose(wt, (1, 0, 2, 3))[:, :, ::-1, ::-1]


def _prep_conv(w_oihw, b):
    Cout, Cin = w_oihw.shape[0], w_oihw.shape[1]
    w_kc = jnp.transpose(w_oihw, (2, 3, 1, 0)).reshape(9 * Cin, Cout)
    pad = (-Cout) % 128
    if pad:
        w_kc = jnp.pad(w_kc, ((0, 0), (0, pad)))
        b = jnp.pad(b, (0, pad))
    return w_kc.astype(jnp.bfloat16), b.astype(jnp.float32).reshape(1, Cout + pad)


def prepare_tiny_unet_params(p):
    out = {}
    for name in ("down0", "down1", "up0"):
        w, b = _prep_conv(p[name + "_w"], p[name + "_b"])
        out[name + "_w"], out[name + "_b"] = w, b
    w, b = _prep_conv(_convT_as_conv_weight(p["up1_w"]), p["up1_b"])
    out["up1_w"], out["up1_b"] = w, b
    return out


# ----------------------------------------------------------------------------
# pixel_shuffle / pixel_unshuffle directly in NHWC, preserving torch's NCHW
# channel ordering (out channel index = c*r*r + i*r + j).
# ----------------------------------------------------------------------------
def pixel_unshuffle_nhwc(x, r):
    n, h, w, c = x.shape
    x = x.reshape(n, h // r, r, w // r, r, c)
    x = jnp.transpose(x, (0, 1, 3, 5, 2, 4))        # (n, h/r, w/r, c, r, r)
    return x.reshape(n, h // r, w // r, c * r * r)


def pixel_shuffle_nhwc(x, r):
    n, h, w, c = x.shape
    x = x.reshape(n, h, w, c // (r * r), r, r)
    x = jnp.transpose(x, (0, 1, 4, 2, 5, 3))        # (n, h, r, w, r, c/r^2)
    return x.reshape(n, h * r, w * r, c // (r * r))


# ----------------------------------------------------------------------------
# TinyUnet forward (NHWC) and the TestSingleStage forward.
# ----------------------------------------------------------------------------
def tiny_unet_forward_nhwc(x, p):
    n, h, w, c = x.shape
    flag = (h % 16 != 0) or (w % 16 != 0)
    if flag:
        h_, w_ = h - h % 16, w - w % 16
        # TODO(synk): torch bicubic uses Keys a=-0.75 / align_corners=False;
        # jax.image cubic uses a=-0.5, so this fallback branch is approximate.
        x = jax.image.resize(x, (n, h_, w_, c), method="bicubic")

    # Intermediate conv outputs are bf16 (consumers re-round to bf16 anyway);
    # only the UNet's final conv output stays f32 (used in dnx / ill).
    x = conv3x3_same_nhwc(x, p["down0_w"], p["down0_b"], 48, jnp.bfloat16)
    x = pixel_unshuffle_nhwc(x, 4)
    x = conv3x3_same_nhwc(x, p["down1_w"], p["down1_b"], 768, jnp.bfloat16)
    # NOTE: the pixel_unshuffle(4) ending `down` and the pixel_shuffle(4)
    # starting `up` are exact inverses -> removed (pure data-movement cleanup).
    x = conv3x3_same_nhwc(x, p["up0_w"], p["up0_b"], 768, jnp.bfloat16)
    x = pixel_shuffle_nhwc(x, 4)
    x = conv3x3_same_nhwc(x, p["up1_w"], p["up1_b"], 48, jnp.float32)  # ConvT rewritten

    if flag:
        x = jax.image.resize(x, (n, h, w, c), method="bicubic")
    return x


def test_single_stage_forward(x_nchw, dn_params, f_params):
    """TestSingleStage.forward: dnx = dn(x); i = f(dnx); r = clamp(dnx/i, 0, 1)."""
    x = jnp.transpose(x_nchw, (0, 2, 3, 1))            # NCHW -> NHWC, once
    dnx = tiny_unet_forward_nhwc(x, dn_params)
    ill = tiny_unet_forward_nhwc(dnx, f_params)
    # NOTE: no eps / clamp on `ill` by design — the original PyTorch does r = x / i.
    res = jnp.clip(dnx / ill, 0.0, 1.0)
    nchw = lambda t: jnp.transpose(t, (0, 3, 1, 2))    # back to torch layout
    return {"inp": [nchw(dnx)], "res": [nchw(res)], "ill": [nchw(ill)],
            "nx": [x_nchw], "dnx": [nchw(dnx)]}


# ----------------------------------------------------------------------------
# Pure-lax reference with the SAME bf16-operand / f32-accumulate math.
# ----------------------------------------------------------------------------
def _conv3x3_same_ref_nhwc(x, w_oihw, b):
    w_hwio = jnp.transpose(w_oihw, (2, 3, 1, 0)).astype(jnp.bfloat16)
    y = lax.conv_general_dilated(
        x.astype(jnp.bfloat16), w_hwio, window_strides=(1, 1),
        padding=((1, 1), (1, 1)), dimension_numbers=("NHWC", "HWIO", "NHWC"),
        preferred_element_type=jnp.float32)
    return y + b[None, None, None, :].astype(jnp.float32)


def tiny_unet_reference_nhwc(x, p):
    x = _conv3x3_same_ref_nhwc(x, p["down0_w"], p["down0_b"])
    x = pixel_unshuffle_nhwc(x, 4)
    x = _conv3x3_same_ref_nhwc(x, p["down1_w"], p["down1_b"])
    # inverse unshuffle/shuffle pair removed here too (exact identity)
    x = _conv3x3_same_ref_nhwc(x, p["up0_w"], p["up0_b"])
    x = pixel_shuffle_nhwc(x, 4)
    x = _conv3x3_same_ref_nhwc(x, _convT_as_conv_weight(p["up1_w"]), p["up1_b"])
    return x


def test_single_stage_reference(x_nchw, dn_p, f_p):
    x = jnp.transpose(x_nchw, (0, 2, 3, 1))
    dnx = tiny_unet_reference_nhwc(x, dn_p)
    ill = tiny_unet_reference_nhwc(dnx, f_p)
    res = jnp.clip(dnx / ill, 0.0, 1.0)
    nchw = lambda t: jnp.transpose(t, (0, 3, 1, 2))
    return {"dnx": nchw(dnx), "ill": nchw(ill), "res": nchw(res)}


# ----------------------------------------------------------------------------
# Deterministic parameter init (shapes from TinyUnet.__init__).
# ----------------------------------------------------------------------------
def init_params(key):
    ks = jax.random.split(key, 8)

    def conv_w(k, co, ci):
        return jax.random.normal(k, (co, ci, 3, 3), jnp.float32) / jnp.sqrt(ci * 9.0)

    return {
        "down0_w": conv_w(ks[0], 48, 48),
        "down0_b": 0.01 * jax.random.normal(ks[1], (48,), jnp.float32),
        "down1_w": conv_w(ks[2], 768, 768),
        "down1_b": 0.01 * jax.random.normal(ks[3], (768,), jnp.float32),
        "up0_w": conv_w(ks[4], 768, 768),
        "up0_b": 0.01 * jax.random.normal(ks[5], (768,), jnp.float32),
        # ConvTranspose2d weight layout: (in_ch, out_ch, kH, kW)
        "up1_w": jax.random.normal(ks[6], (48, 48, 3, 3), jnp.float32) / jnp.sqrt(48 * 9.0),
        "up1_b": 0.01 * jax.random.normal(ks[7], (48,), jnp.float32),
    }


if __name__ == "__main__":
    key = jax.random.PRNGKey(0)
    k_dn, k_f, k_x, k_t = jax.random.split(key, 4)
    dn_params = init_params(k_dn)
    f_params = init_params(k_f)
    x = jax.random.normal(k_x, (2, 48, 16, 16), jnp.float32)

    dn_prep = prepare_tiny_unet_params(dn_params)
    f_prep = prepare_tiny_unet_params(f_params)

    # --- per-kernel unit checks (same inputs -> only accumulation-order diff)
    conv_jit = jax.jit(conv3x3_same_nhwc, static_argnums=(3, 4))

    def unit_check(shape_nhwc, w, b, tol=2e-3):
        xt = jax.random.normal(k_t, shape_nhwc, jnp.float32)
        cout = w.shape[0]
        w_kc, b_1c = _prep_conv(w, b)
        got = jax.block_until_ready(conv_jit(xt, w_kc, b_1c, cout, jnp.float32))
        want = _conv3x3_same_ref_nhwc(xt, w, b)
        err = float(jnp.max(jnp.abs(got - want)))
        assert err < tol, f"conv kernel mismatch: {err}"

    unit_check((2, 16, 16, 48), dn_params["down0_w"], dn_params["down0_b"])   # padded Cout path
    unit_check((2, 4, 4, 768), dn_params["down1_w"], dn_params["down1_b"])    # 768-channel path

    # --- full TestSingleStage forward (Pallas) vs pure-lax reference
    fwd = jax.jit(test_single_stage_forward)
    out = jax.block_until_ready(fwd(x, dn_prep, f_prep))
    res, ill, dnx = out["res"][0], out["ill"][0], out["dnx"][0]
    assert res.shape == (2, 48, 16, 16), res.shape

    ref = test_single_stage_reference(x, dn_params, f_params)
    err_dnx = float(jnp.max(jnp.abs(dnx - ref["dnx"])))
    err_ill = float(jnp.max(jnp.abs(ill - ref["ill"])))
    # bf16 rounding points are aligned between the two pipelines; the residual
    # difference is matmul accumulation order (im2col matmul vs XLA conv).
    assert err_dnx < 3e-2, f"dnx mismatch vs reference: {err_dnx}"
    assert err_ill < 8e-2, f"ill mismatch vs reference: {err_ill}"
    assert bool(jnp.all(jnp.isfinite(res)))
    assert float(jnp.min(res)) >= 0.0 and float(jnp.max(res)) <= 1.0

    print("KERNEL_OK")
</pallas_src>

<mosaic_0001>
module attributes {stable_mosaic.version = 11 : i64} {
  func.func @_matmul_bias_kernel(%arg0: i32, %arg1: i32, %arg2: memref<256x432xbf16, #tpu.memory_space<vmem>>, %arg3: memref<432x128xbf16, #tpu.memory_space<vmem>>, %arg4: memref<1x128xf32, #tpu.memory_space<vmem>>, %arg5: memref<256x128xf32, #tpu.memory_space<vmem>>) attributes {dimension_semantics = [#tpu.dimension_semantics<parallel>, #tpu.dimension_semantics<parallel>], iteration_bounds = array<i64: 1, 2>, scalar_prefetch = 0 : i64, scratch_operands = 0 : i64, tpu.core_type = #tpu.core_type<tc>, window_params = [{transform_indices = @transform_0, window_bounds = array<i64: 256, 432>}, {transform_indices = @transform_1, window_bounds = array<i64: 432, 128>}, {transform_indices = @transform_2, window_bounds = array<i64: 1, 128>}, {transform_indices = @transform_3, window_bounds = array<i64: 256, 128>}]} {
    %c0 = arith.constant 0 : index
    %c0_0 = arith.constant 0 : index
    %0 = vector.load %arg2[%c0, %c0_0] : memref<256x432xbf16, #tpu.memory_space<vmem>>, vector<256x432xbf16>
    %c0_1 = arith.constant 0 : index
    %c0_2 = arith.constant 0 : index
    %1 = vector.load %arg3[%c0_1, %c0_2] : memref<432x128xbf16, #tpu.memory_space<vmem>>, vector<432x128xbf16>
    %cst = arith.constant dense<0.000000e+00> : vector<256x128xf32>
    %2 = tpu.matmul %0, %1, %cst {dimension_numbers = #tpu.dot_dimension_numbers<[1], [0], [0], [1], [0, 0, 1, 1], [], []>} : vector<256x432xbf16>, vector<432x128xbf16>, vector<256x128xf32> -> vector<256x128xf32>
    %c0_3 = arith.constant 0 : index
    %c0_4 = arith.constant 0 : index
    %3 = vector.load %arg4[%c0_3, %c0_4] : memref<1x128xf32, #tpu.memory_space<vmem>>, vector<1x128xf32>
    %4 = vector.broadcast %3 : vector<1x128xf32> to vector<256x128xf32>
    %5 = arith.addf %2, %4 : vector<256x128xf32>
    %c0_5 = arith.constant 0 : index
    %c0_6 = arith.constant 0 : index
    %6 = vector.load %arg5[%c0_5, %c0_6] : memref<256x128xf32, #tpu.memory_space<vmem>>, vector<256x128xf32>
    tpu.vector_store %arg5[%c0_5, %c0_6], %5 {strides = array<i32>} : memref<256x128xf32, #tpu.memory_space<vmem>>, vector<256x128xf32>,
    return
  }
  func.func @transform_0(%arg0: i32, %arg1: i32) -> (i32, i32) {
    %c0_i32 = arith.constant 0 : i32
    %c0_i32_0 = arith.constant 0 : i32
    return %arg1, %c0_i32 : i32, i32
  }
  func.func @transform_1(%arg0: i32, %arg1: i32) -> (i32, i32) {
    %c0_i32 = arith.constant 0 : i32
    %c0_i32_0 = arith.constant 0 : i32
    return %c0_i32, %arg0 : i32, i32
  }
  func.func @transform_2(%arg0: i32, %arg1: i32) -> (i32, i32) {
    %c0_i32 = arith.constant 0 : i32
    %c0_i32_0 = arith.constant 0 : i32
    return %c0_i32, %arg0 : i32, i32
  }
  func.func @transform_3(%arg0: i32, %arg1: i32) -> (i32, i32) {
    %c0_i32 = arith.constant 0 : i32
    return %arg1, %arg0 : i32, i32
  }
}

</mosaic_0001>

<bundles_post_ra>
// kernel: conv3x3_same_nhwc.1
= control target key start
LH: loop header
LB: loop body
LE: loop exit
PB: predicated region body
PF: predicated region fallthrough
CT: control target
= control target key end

     0   :  { %8 = vsyncpa [#allocation3], 0  ;;  %s2216_s0 = inlined_call_operand.vmem [shape: bf16[512,432], index: 0, kind: input, shape index: {}]   ;;  %s2217_s1 = inlined_call_operand.vmem [shape: bf16[432,128], index: 1, kind: input, shape index: {}]   ;;  %s2218_s2 = inlined_call_operand.vmem [shape: f32[1,128], index: 2, kind: input, shape index: {}]   ;;  %s2219_s3 = inlined_call_operand.hbm [shape: f32[512,128], index: 3, kind: output, shape index: {}]  }
   0x1   :  { %10 = vsyncpa [#allocation3 + $0x1], 0  ;;  %s1852_s12 = smov 0   ;;  %s1854_s13 = smov 0  }
   0x2   :  { %s1856_s14 = smov 0   ;;  %s1858_s15 = smov 0  }
   0x3   :  { %s1860_s16 = smov 0   ;;  %s1862_s17 = smov 0  }
   0x4 LB: > { %s1329_s18 = sadd.s32 4294967295, %s1826_s17   ;;  %s1330_s19 = sadd.s32 4294967294, %s1826_s17   ;;  %s1826_s17 = sphi %s1862_s17, %s16_s17   ;;  %s1822_s16 = sphi %s1860_s16, %s2226_s16   ;;  %s1818_s15 = sphi %s1858_s15, %s2225_s15   ;;  %s1814_s14 = sphi %s1856_s14, %s2224_s14   ;;  %s1810_s13 = sphi %s1854_s13, %s2223_s13   ;;  %s1806_s12 = sphi %s1852_s12, %s2222_s12  }
   0x5   : > { %s25_s20 = sadd.s32 1, %s1822_s16  ;;  %s115_s21 = sadd.s32 1, %s1814_s14 }
   0x6   : > { %p26_p0 = scmp.ge.s32.totalorder %s25_s20, 2  ;;  %p125_p1 = scmp.ne.s32.totalorder %s1814_s14, %s1810_s13 }
   0x7   : > { %p126_p2 = scmp.eq.s32.totalorder %s1329_s18, 1  ;;  %p131_p3 = scmp.ne.s32.totalorder %s1810_s13, %s1806_s12 }
   0x8   : > { %s2228_s20 = smov (%p26_p0, %s25_s20), 0  ;;  %p132_p5 = scmp.eq.s32.totalorder %s1330_s19, 1 }
   0x9   : > { %p1892_p4 = por %p126_p2, %p125_p1  ;;  %s110_s23 = ssub.s32 %s1822_s16, %s2228_s20 }
   0xa   : > { %p1335_p6 = scmp.ge.s32.totalorder %s1826_s17, 1  ;;  %p113_p7 = scmp.eq.s32.totalorder %s110_s23, 0 }
   0xb   : > { %p1899_p8 = por %p132_p5, %p131_p3  ;;  %p173_p9 = scmp.lt.s32.totalorder %s1826_s17, 3 }
   0xc   : > { %s1905_s25 = scalar_select %p113_p7, %s1814_s14, %s115_s21  }
   0xd   : > { %p174_p10 = pnand %p1335_p6, %p173_p9 }
   0xe   : > { %v1625_v0 = vld [vmem:[%s2217_s1 + $0x80] sm:$0xff] (!%p174_p10)   ;;  %v1828_v1 = vmov (!%p174_p10), 0   ;;  %v1628_v4 = vld [vmem:[%s2217_s1 + $0x88] sm:$0xff] (!%p174_p10)   ;;  %v1631_v7 = vld [vmem:[%s2217_s1 + $0x90] sm:$0xff] (!%p174_p10)   ;;  %s1337_s29 = sshll.u32 (!%p174_p10), %s1818_s15, 5  ;;  %vm812_vm0 = vcmask (!%p174_p10), 392192  }
   0xf   : > { %177 = sbr.rel (%p174_p10) target bundleno = 410 (0x19a), region = 32  ;;  %1022 = vmatprep.subr.bf16.mxu1 (!%p174_p10), %v1828_v1  ;;  %v1626_v2 = vld [vmem:[%s2217_s1 + $0x40] sm:$0xff] (!%p174_p10)   ;;  %v1629_v5 = vld [vmem:[%s2217_s1 + $0x48] sm:$0xff] (!%p174_p10)   ;;  %v1632_v8 = vld [vmem:[%s2217_s1 + $0x50] sm:$0xff] (!%p174_p10)   ;;  %p206_p11 = scmp.lt.s32.totalorder (!%p174_p10), %s1337_s29, 63 }
  0x10   : > { %1023 = vmatpush1.bf16.msra.mxu1 (!%p174_p10), %v1625_v0  ;;  %v1627_v3 = vld [vmem:[%s2217_s1] sm:$0xff] (!%p174_p10)   ;;  %1455 = vmatprep.subr.bf16.mxu0 (!%p174_p10), %v1626_v2  ;;  %v1630_v6 = vld [vmem:[%s2217_s1 + $0x8] sm:$0xff] (!%p174_p10)   ;;  %v1633_v9 = vld [vmem:[%s2217_s1 + $0x10] sm:$0xff] (!%p174_p10)   ;;  %s202_s8 = sand.u32 (!%p174_p10), 1, %s1810_s13   ;;  %s1454_s18 = sshll.u32 (!%p174_p10), %s1818_s15, 12 }
  0x11   : > { %1024 = vmatprep.subr.bf16.mxu1 (!%p174_p10), %v1828_v1  ;;  %1456 = vmatpush3.bf16.msra.mxu0 (!%p174_p10), %v1627_v3  ;;  %v1634_v10 = vld [vmem:[%s2217_s1 + $0x98] sm:$0xff] (!%p174_p10)   ;;  %v1638_v13 = vld [vmem:[%s2217_s1 + $0x60] sm:$0xff] (!%p174_p10)   ;;  %v1641_v16 = vld [vmem:[%s2217_s1 + $0x68] sm:$0xff] (!%p174_p10)   ;;  %s1336_s11 = sshll.u32 (!%p174_p10), %s202_s8, 8  ;;  %s2162_s26 = scalar_lea.hbm (!%p174_p10), %s2219_s3, %s1454_s18 }
  0x12   : > { %1457 = vmatprep.subr.bf16.mxu0 (!%p174_p10), %v1629_v5  ;;  %v1635_v11 = vld [vmem:[%s2217_s1 + $0x58] sm:$0xff] (!%p174_p10)   ;;  %v1637_v14 = vld [vmem:[%s2217_s1 + $0xa0] sm:$0xff] (!%p174_p10)   ;;  %v1640_v17 = vld [vmem:[%s2217_s1 + $0xa8] sm:$0xff] (!%p174_p10)   ;;  %s2170_s15 = scalar_lea.sflag (!%p174_p10), [#allocation3], %s202_s8  ;;  %s1829_s28 = smov (!%p174_p10), [#allocation2]  }
  0x13   : > { %v1636_v12 = vld [vmem:[%s2217_s1 + $0x18] sm:$0xff] (!%p174_p10)   ;;  %v1639_v15 = vld [vmem:[%s2217_s1 + $0x20] sm:$0xff] (!%p174_p10)   ;;  %v1642_v18 = vld [vmem:[%s2217_s1 + $0x28] sm:$0xff] (!%p174_p10)  }
  0x14   : > { %1025 = vmatpush1.bf16.msra.mxu1 (!%p174_p10), %v1628_v4  ;;  %v1644_v19 = vld [vmem:[%s2217_s1 + $0x70] sm:$0xff] (!%p174_p10)   ;;  %v1646_v22 = vld [vmem:[%s2217_s1 + $0xb8] sm:$0xff] (!%p174_p10)   ;;  %v1649_v26 = vld [vmem:[%s2217_s1 + $0xc0] sm:$0xff] (!%p174_p10)  }
  0x15   : > { %1026 = vmatprep.subr.bf16.mxu1 (!%p174_p10), %v1828_v1  ;;  %1458 = vmatpush3.bf16.msra.mxu0 (!%p174_p10), %v1630_v6  ;;  %v1643_v20 = vld [vmem:[%s2217_s1 + $0xb0] sm:$0xff] (!%p174_p10)   ;;  %v1647_v23 = vld [vmem:[%s2217_s1 + $0x78] sm:$0xff] (!%p174_p10)   ;;  %v1653_v30 = vld [vmem:[%s2217_s1 + $0xc8] sm:$0xff] (!%p174_p10)  }
  0x16   : > { %1459 = vmatprep.subr.bf16.mxu0 %v1632_v8  ;;  %s2230_s29 = smov (!%p206_p11, %s1337_s29), 63  ;;  %v1645_v21 = vld [vmem:[%s2217_s1 + $0x30] sm:$0xff]   ;;  %v1648_v25 = vld [vmem:[%s2217_s1 + $0x38] sm:$0xff]  }
  0x17   : > { %s1453_s30 = sshll.u32 %s2230_s29, 4  ;;  %v1654_v31 = vld [vmem:[%s2217_s1 + $0xd0] sm:$0xff]  }
  0x18   : > { %1027 = vmatpush1.bf16.msra.mxu1 %v1631_v7  ;;  %s1981_s29 = scalar_lea.vmem %s2216_s0, %s1453_s30  ;;  %s1752_s30 = sshll.u32 %s1829_s28, 4  ;;  %s1753_s30 = int_to_ptr.vmem [resolvable:$false] %s1752_s30 }
  0x19   : > { %1028 = vmatprep.subr.bf16.mxu1 %v1828_v1  ;;  %1460 = vmatpush3.bf16.msra.mxu0 %v1633_v9  ;;  %v1652_v24 = vld [vmem:[%s1981_s29 + $0x4] ss:$16 sps:$4 sm:$0xff]   ;;  %v1659_v27 = vld [vmem:[%s1981_s29 + $0xc] ss:$16 sps:$4 sm:$0xff]   ;;  %v1650_v28 = vld [vmem:[%s1981_s29] ss:$16 sps:$4 sm:$0xff]  }
  0x1a   : > { %1461 = vmatprep.subr.bf16.mxu0 %v1635_v11  ;;  %893 = vmatprep.mubr.bf16.mxu0 %v1652_v24  ;;  %v1655_v29 = vld [vmem:[%s1981_s29 + $0x24] ss:$16 sps:$4 sm:$0xff]   ;;  %v1660_v32 = vld [vmem:[%s1981_s29 + $0x20] ss:$16 sps:$4 sm:$0xff]   ;;  %v1657_v34 = vld [vmem:[%s1981_s29 + $0x8] ss:$16 sps:$4 sm:$0xff]  }
  0x1b   : > { %1432 = vmatprep.mubr.msk.bf16.mxu1 %vm812_vm0, %v1659_v27  ;;  %v1661_v33 = vld [vmem:[%s1981_s29 + $0x44] ss:$16 sps:$4 sm:$0xff]   ;;  %v1663_v35 = vld [vmem:[%s1981_s29 + $0x2c] ss:$16 sps:$4 sm:$0xff]   ;;  %v1665_v36 = vld [vmem:[%s1981_s29 + $0x40] ss:$16 sps:$4 sm:$0xff]  }
  0x1c   : > { %1029 = vmatpush1.bf16.msra.mxu1 %v1634_v10  ;;  %v1667_v37 = vld [vmem:[%s1981_s29 + $0x64] ss:$16 sps:$4 sm:$0xff]   ;;  %v1666_v38 = vld [vmem:[%s1981_s29 + $0x28] ss:$16 sps:$4 sm:$0xff]   ;;  %v1669_v39 = vld [vmem:[%s1981_s29 + $0x4c] ss:$16 sps:$4 sm:$0xff]  }
  0x1d   : > { %1030 = vmatprep.subr.bf16.mxu1 %v1828_v1  ;;  %1462 = vmatpush3.bf16.msra.mxu0 %v1636_v12  ;;  %v1671_v40 = vld [vmem:[%s1981_s29 + $0x60] ss:$16 sps:$4 sm:$0xff]   ;;  %v1673_v41 = vld [vmem:[%s1981_s29 + $0x84] ss:$16 sps:$4 sm:$0xff]   ;;  %v1672_v42 = vld [vmem:[%s1981_s29 + $0x48] ss:$16 sps:$4 sm:$0xff]  }
  0x1e   : > { %1463 = vmatprep.subr.bf16.mxu0 %v1638_v13  ;;  %v1675_v43 = vld [vmem:[%s1981_s29 + $0x6c] ss:$16 sps:$4 sm:$0xff]   ;;  %v1677_v44 = vld [vmem:[%s1981_s29 + $0x80] ss:$16 sps:$4 sm:$0xff]   ;;  %v1679_v45 = vld [vmem:[%s1981_s29 + $0xa4] ss:$16 sps:$4 sm:$0xff]  }
  0x1f   : > { %v1678_v46 = vld [vmem:[%s1981_s29 + $0x68] ss:$16 sps:$4 sm:$0xff]   ;;  %v1681_v47 = vld [vmem:[%s1981_s29 + $0x8c] ss:$16 sps:$4 sm:$0xff]   ;;  %v1683_v48 = vld [vmem:[%s1981_s29 + $0xa0] ss:$16 sps:$4 sm:$0xff]  }
  0x20   : > { %1031 = vmatpush1.bf16.msra.mxu1 %v1637_v14  ;;  %v1685_v49 = vld [vmem:[%s1981_s29 + $0xc4] ss:$16 sps:$4 sm:$0xff]   ;;  %v1684_v50 = vld [vmem:[%s1981_s29 + $0x88] ss:$16 sps:$4 sm:$0xff]   ;;  %v1687_v51 = vld [vmem:[%s1981_s29 + $0xac] ss:$16 sps:$4 sm:$0xff]  }
  0x21   : > { %1032 = vmatprep.subr.bf16.mxu1 %v1828_v1  ;;  %1464 = vmatpush3.bf16.msra.mxu0 %v1639_v15  ;;  %v1689_v52 = vld [vmem:[%s1981_s29 + $0xc0] ss:$16 sps:$4 sm:$0xff]   ;;  %v1691_v53 = vld [vmem:[%s1981_s29 + $0xe4] ss:$16 sps:$4 sm:$0xff]   ;;  %v1690_v54 = vld [vmem:[%s1981_s29 + $0xa8] ss:$16 sps:$4 sm:$0xff]  }
  0x22   : > { %1465 = vmatprep.subr.bf16.mxu0 %v1641_v16  ;;  %v1693_v55 = vld [vmem:[%s1981_s29 + $0xcc] ss:$16 sps:$4 sm:$0xff]   ;;  %v1695_v56 = vld [vmem:[%s1981_s29 + $0xe0] ss:$16 sps:$4 sm:$0xff]   ;;  %v1697_v57 = vld [vmem:[%s1981_s29 + $0x104] ss:$16 sps:$4 sm:$0xff]  }
  0x23   : > { %v1696_v58 = vld [vmem:[%s1981_s29 + $0xc8] ss:$16 sps:$4 sm:$0xff]   ;;  %v1699_v59 = vld [vmem:[%s1981_s29 + $0xec] ss:$16 sps:$4 sm:$0xff]   ;;  %v1701_v60 = vld [vmem:[%s1981_s29 + $0x100] ss:$16 sps:$4 sm:$0xff]  }
  0x24   : > { %1033 = vmatpush1.bf16.msra.mxu1 %v1640_v17  ;;  %v1703_v61 = vld [vmem:[%s1981_s29 + $0x124] ss:$16 sps:$4 sm:$0xff]   ;;  %v1702_v62 = vld [vmem:[%s1981_s29 + $0xe8] ss:$16 sps:$4 sm:$0xff]   ;;  %v1705_v63 = vld [vmem:[%s1981_s29 + $0x10c] ss:$16 sps:$4 sm:$0xff]  }
  0x25   : > { %1034 = vmatprep.subr.bf16.mxu1 %v1828_v1  ;;  %1466 = vmatpush3.bf16.msra.mxu0 %v1642_v18  ;;  %v1707_v0 = vld [vmem:[%s1981_s29 + $0x120] ss:$16 sps:$4 sm:$0xff]   ;;  %v1708_v2 = vld [vmem:[%s1981_s29 + $0x108] ss:$16 sps:$4 sm:$0xff]   ;;  %v1711_v3 = vld [vmem:[%s1981_s29 + $0x12c] ss:$16 sps:$4 sm:$0xff]  }
  0x26   : > { %1467 = vmatprep.subr.bf16.mxu0 %v1644_v19  ;;  %v1713_v4 = vld [vmem:[%s1981_s29 + $0x140] ss:$16 sps:$4 sm:$0xff]   ;;  %v1715_v5 = vld [vmem:[%s1981_s29 + $0x164] ss:$16 sps:$4 sm:$0xff]   ;;  %v1714_v6 = vld [vmem:[%s1981_s29 + $0x128] ss:$16 sps:$4 sm:$0xff]  }
  0x27   : > { %v1717_v7 = vld [vmem:[%s1981_s29 + $0x14c] ss:$16 sps:$4 sm:$0xff]   ;;  %v1719_v8 = vld [vmem:[%s1981_s29 + $0x160] ss:$16 sps:$4 sm:$0xff]   ;;  %v1721_v9 = vld [vmem:[%s1981_s29 + $0x184] ss:$16 sps:$4 sm:$0xff]  }
  0x28   : > { %1035 = vmatpush1.bf16.msra.mxu1 %v1643_v20  ;;  %v1720_v10 = vld [vmem:[%s1981_s29 + $0x148] ss:$16 sps:$4 sm:$0xff]   ;;  %v1723_v11 = vld [vmem:[%s1981_s29 + $0x16c] ss:$16 sps:$4 sm:$0xff]   ;;  %v1725_v12 = vld [vmem:[%s1981_s29 + $0x180] ss:$16 sps:$4 sm:$0xff]  }
  0x29   : > { %1036 = vmatprep.subr.bf16.mxu1 %v1828_v1  ;;  %1468 = vmatpush3.bf16.msra.mxu0 %v1645_v21  ;;  %v1727_v13 = vld [vmem:[%s1981_s29 + $0x1a4] ss:$16 sps:$4 sm:$0xff]   ;;  %v1726_v14 = vld [vmem:[%s1981_s29 + $0x168] ss:$16 sps:$4 sm:$0xff]   ;;  %v1729_v15 = vld [vmem:[%s1981_s29 + $0x18c] ss:$16 sps:$4 sm:$0xff]  }
  0x2a   : > { %1469 = vmatprep.subr.bf16.mxu0 %v1647_v23  ;;  %v1731_v16 = vld [vmem:[%s1981_s29 + $0x1a0] ss:$16 sps:$4 sm:$0xff]   ;;  %v1733_v17 = vld [vmem:[%s1981_s29 + $0x1c4] ss:$16 sps:$4 sm:$0xff]   ;;  %v1732_v18 = vld [vmem:[%s1981_s29 + $0x188] ss:$16 sps:$4 sm:$0xff]  }
  0x2b   : > { %v1735_v19 = vld [vmem:[%s1981_s29 + $0x1ac] ss:$16 sps:$4 sm:$0xff]   ;;  %v1737_v20 = vld [vmem:[%s1981_s29 + $0x1c0] ss:$16 sps:$4 sm:$0xff]   ;;  %v1739_v21 = vld [vmem:[%s1981_s29 + $0x1e4] ss:$16 sps:$4 sm:$0xff]  }
  0x2c   : > { %1037 = vmatpush1.bf16.msra.mxu1 %v1646_v22  ;;  %v1738_v22 = vld [vmem:[%s1981_s29 + $0x1a8] ss:$16 sps:$4 sm:$0xff]   ;;  %v1741_v23 = vld [vmem:[%s1981_s29 + $0x1cc] ss:$16 sps:$4 sm:$0xff]   ;;  %v1743_v24 = vld [vmem:[%s1981_s29 + $0x1e0] ss:$16 sps:$4 sm:$0xff]  }
  0x2d   : > { %1038 = vmatprep.subr.bf16.mxu1 %v1828_v1  ;;  %1470 = vmatpush3.bf16.msra.mxu0 %v1648_v25  ;;  %v1744_v25 = vld [vmem:[%s1981_s29 + $0x1c8] ss:$16 sps:$4 sm:$0xff]   ;;  %s1754_s4 = scalar_lea.vmem %s1753_s30, 8192 }
  0x2e   : > { %v1747_v27 = vld [vmem:[%s1981_s29 + $0x1e8] ss:$16 sps:$4 sm:$0xff]  }
  0x30   : > { %1039 = vmatpush1.bf16.msra.mxu1 %v1649_v26  ;;  %894 = vmatmul.mubr.bf16.vlgmr.msra.gmra.mrb[0].mxu0 %v1650_v28  ;;  %v1745_v26 = vld [vmem:[%s1981_s29 + $0x1ec] ss:$16 sps:$4 sm:$0xff]  }
  0x31   : > { %1040 = vmatprep.subr.bf16.mxu1 %v1828_v1  ;;  %901 = vmatprep.mubr.bf16.mxu0 %v1655_v29 }
  0x34   : > { %1041 = vmatpush1.bf16.msra.mxu1 %v1653_v30 }
  0x35   : > { %1042 = vmatprep.subr.bf16.mxu1 %v1828_v1  ;;  %v1709_v1 = vld [vmem:[%s1981_s29 + $0x144] ss:$16 sps:$4 sm:$0xff]   ;;  %s2095_s29 = scalar_lea.vmem [#allocation2], %s1336_s11 }
  0x36   : > { %s1230_s19 = sshll.u32 %s2095_s29, 4  ;;  %s2164_s19 = int_to_ptr.vmem [resolvable:$true] %s1230_s19 }
  0x37   : > { %s1748_s27 = scalar_lea.vmem %s2164_s19, 4096  ;;  %p1755_p1 = scmp.lt.s32.totalorder %s2164_s19, %s1753_s30 }
  0x38   : > { %1043 = vmatpush1.bf16.msra.mxu1 %v1654_v31  ;;  %902 = vmatmul.mubr.bf16.gmra.mrb[4].mxu0 %v1660_v32  ;;  %p1749_p12 = scmp.ne.s32.totalorder %s2164_s19, %s1748_s27  ;;  %p1756_p2 = scmp.lt.s32.totalorder %s1754_s4, %s1748_s27 }
  0x39   : > { %909 = vmatprep.mubr.bf16.mxu0 %v1661_v33 }
  0x3a   : > { %p1750_p13 = pnand %p1749_p12, %p1892_p4  ;;  %p1757_p3 = por %p1756_p2, %p1755_p1 }
  0x3b   : > { %1055 = vmatmul.mubr.bf16.vlgmr.msra.gmra.mrb[0].mxu1 %v1657_v34  ;;  %v2089_v34 = vld [vmem:[%s2218_s2] ss:$0 sm:$0xff] }
  0x3c   : > { %1433 = vmatprep.mubr.msk.bf16.mxu1 %vm812_vm0, %v1663_v35  ;;  %p1751_p0 = pneg %p1750_p13 }
  0x3e   : > { %p1758_p5 = pnand %p1757_p3, %p1751_p0 }
  0x40   : > { %910 = vmatmul.mubr.bf16.gmra.mrb[8].mxu0 %v1665_v36 }
  0x41   : > { %917 = vmatprep.mubr.bf16.mxu0 %v1667_v37 }
  0x43   : > { %1063 = vmatmul.mubr.bf16.gmra.mrb[4].mxu1 %v1666_v38 }
  0x44   : > { %1434 = vmatprep.mubr.msk.bf16.mxu1 %vm812_vm0, %v1669_v39 }
  0x48   : > { %918 = vmatmul.mubr.bf16.gmra.mrb[12].mxu0 %v1671_v40 }
  0x49   : > { %925 = vmatprep.mubr.bf16.mxu0 %v1673_v41 }
  0x4b   : > { %1071 = vmatmul.mubr.bf16.gmra.mrb[8].mxu1 %v1672_v42 }
  0x4c   : > { %1435 = vmatprep.mubr.msk.bf16.mxu1 %vm812_vm0, %v1675_v43 }
  0x50   : > { %926 = vmatmul.mubr.bf16.gmra.mrb[16].mxu0 %v1677_v44 }
  0x51   : > { %933 = vmatprep.mubr.bf16.mxu0 %v1679_v45 }
  0x53   : > { %1079 = vmatmul.mubr.bf16.gmra.mrb[12].mxu1 %v1678_v46 }
  0x54   : > { %1436 = vmatprep.mubr.msk.bf16.mxu1 %vm812_vm0, %v1681_v47 }
  0x58   : > { %934 = vmatmul.mubr.bf16.gmra.mrb[20].mxu0 %v1683_v48 }
  0x59   : > { %941 = vmatprep.mubr.bf16.mxu0 %v1685_v49 }
  0x5b   : > { %1087 = vmatmul.mubr.bf16.gmra.mrb[16].mxu1 %v1684_v50 }
  0x5c   : > { %1437 = vmatprep.mubr.msk.bf16.mxu1 %vm812_vm0, %v1687_v51 }
  0x60   : > { %942 = vmatmul.mubr.bf16.gmra.mrb[24].mxu0 %v1689_v52 }
  0x61   : > { %949 = vmatprep.mubr.bf16.mxu0 %v1691_v53 }
  0x63   : > { %1095 = vmatmul.mubr.bf16.gmra.mrb[20].mxu1 %v1690_v54 }
  0x64   : > { %1438 = vmatprep.mubr.msk.bf16.mxu1 %vm812_vm0, %v1693_v55 }
  0x68   : > { %950 = vmatmul.mubr.bf16.gmra.mrb[28].mxu0 %v1695_v56 }
  0x69   : > { %957 = vmatprep.mubr.bf16.mxu0 %v1697_v57 }
  0x6b   : > { %1103 = vmatmul.mubr.bf16.gmra.mrb[24].mxu1 %v1696_v58 }
  0x6c   : > { %1439 = vmatprep.mubr.msk.bf16.mxu1 %vm812_vm0, %v1699_v59 }
  0x70   : > { %958 = vmatmul.mubr.bf16.gmra.mrb[32].mxu0 %v1701_v60 }
  0x71   : > { %965 = vmatprep.mubr.bf16.mxu0 %v1703_v61 }
  0x73   : > { %1111 = vmatmul.mubr.bf16.gmra.mrb[28].mxu1 %v1702_v62 }
  0x74   : > { %1440 = vmatprep.mubr.msk.bf16.mxu1 %vm812_vm0, %v1705_v63 }
  0x78   : > { %966 = vmatmul.mubr.bf16.gmra.mrb[36].mxu0 %v1707_v0 }
  0x79   : > { %973 = vmatprep.mubr.bf16.mxu0 %v1709_v1 }
  0x7b   : > { %1119 = vmatmul.mubr.bf16.gmra.mrb[32].mxu1 %v1708_v2 }
  0x7c   : > { %1441 = vmatprep.mubr.msk.bf16.mxu1 %vm812_vm0, %v1711_v3 }
  0x80   : > { %974 = vmatmul.mubr.bf16.gmra.mrb[40].mxu0 %v1713_v4 }
  0x81   : > { %981 = vmatprep.mubr.bf16.mxu0 %v1715_v5 }
  0x83   : > { %1127 = vmatmul.mubr.bf16.gmra.mrb[36].mxu1 %v1714_v6 }
  0x84   : > { %1442 = vmatprep.mubr.msk.bf16.mxu1 %vm812_vm0, %v1717_v7 }
  0x88   : > { %982 = vmatmul.mubr.bf16.gmra.mrb[44].mxu0 %v1719_v8 }
  0x89   : > { %989 = vmatprep.mubr.bf16.mxu0 %v1721_v9 }
  0x8b   : > { %1135 = vmatmul.mubr.bf16.gmra.mrb[40].mxu1 %v1720_v10 }
  0x8c   : > { %1443 = vmatprep.mubr.msk.bf16.mxu1 %vm812_vm0, %v1723_v11 }
  0x90   : > { %990 = vmatmul.mubr.bf16.gmra.mrb[48].mxu0 %v1725_v12 }
  0x91   : > { %997 = vmatprep.mubr.bf16.mxu0 %v1727_v13 }
  0x93   : > { %1143 = vmatmul.mubr.bf16.gmra.mrb[44].mxu1 %v1726_v14 }
  0x94   : > { %1444 = vmatprep.mubr.msk.bf16.mxu1 %vm812_vm0, %v1729_v15 }
  0x98   : > { %998 = vmatmul.mubr.bf16.gmra.mrb[52].mxu0 %v1731_v16 }
  0x99   : > { %1005 = vmatprep.mubr.bf16.mxu0 %v1733_v17 }
  0x9b   : > { %1151 = vmatmul.mubr.bf16.gmra.mrb[48].mxu1 %v1732_v18 }
  0x9c   : > { %1445 = vmatprep.mubr.msk.bf16.mxu1 %vm812_vm0, %v1735_v19 }
  0xa0   : > { %1006 = vmatmul.mubr.bf16.gmra.mrb[56].mxu0 %v1737_v20 }
  0xa1   : > { %1013 = vmatprep.mubr.bf16.mxu0 %v1739_v21 }
  0xa3   : > { %1159 = vmatmul.mubr.bf16.gmra.mrb[52].mxu1 %v1738_v22 }
  0xa4   : > { %1446 = vmatprep.mubr.msk.bf16.mxu1 %vm812_vm0, %v1741_v23 }
  0xa8   : > { %1014 = vmatmul.mubr.bf16.gmra.mrb[60].mxu0 %v1743_v24 }
  0xab   : > { %1167 = vmatmul.mubr.bf16.gmra.mrb[56].mxu1 %v1744_v25 }
  0xac   : > { %1447 = vmatprep.mubr.msk.bf16.mxu1 %vm812_vm0, %v1745_v26 }
  0xb3   : > { %1175 = vmatmul.mubr.bf16.gmra.mrb[60].mxu1 %v1747_v27 }
 0x103   : > { %v1471_v28 = vpop.f32.mrb[0].mxu0 }
 0x104   : > { %v1472_v29 = vpop.f32.mrb[1].mxu0 }
 0x105   : > { %v1473_v30 = vadd.f32 %v1472_v29, %v1471_v28  ;;  %v1474_v31 = vpop.f32.mrb[2].mxu0 }
 0x106   : > { %v1475_v32 = vpop.f32.mrb[3].mxu0 }
 0x107   : > { %v1476_v33 = vadd.f32 %v1475_v32, %v1474_v31  ;;  %v896_v35 = vadd.f32 %v1473_v30, %v2089_v34 }
 0x109   : > { %v899_v43 = vadd.f32 %v1476_v33, %v2089_v34 }
 0x10b   : > { %v1477_v36 = vpop.f32.mrb[4].mxu0 }
 0x10c   : > { %v1478_v37 = vpop.f32.mrb[5].mxu0 }
 0x10d   : > { %v1479_v39 = vadd.f32 %v1478_v37, %v1477_v36  ;;  %v1480_v40 = vpop.f32.mrb[6].mxu0 }
 0x10e   : > { %v1056_v38 = vpop.f32.mrb[0].mxu1  ;;  %v1481_v44 = vpop.f32.mrb[7].mxu0 }
 0x10f   : > { %v1057_v41 = vadd.f32 %v1056_v38, %v896_v35  ;;  %v1058_v42 = vpop.f32.mrb[1].mxu1  ;;  %v1482_v46 = vadd.f32 %v1481_v44, %v1480_v40  ;;  %v904_v49 = vadd.f32 %v1479_v39, %v2089_v34 }
 0x110   : > { %v1059_v45 = vpop.f32.mrb[2].mxu1 }
 0x111   : > { %1183 = vst [vmem:[%s2095_s29] sm:$0xff] %v1057_v41  ;;  %v1060_v47 = vadd.f32 %v1059_v45, %v899_v43  ;;  %v1061_v48 = vpop.f32.mrb[3].mxu1  ;;  %v907_v57 = vadd.f32 %v1482_v46, %v2089_v34 }
 0x113   : > { %1184 = vst [vmem:[%s2095_s29 + $0x8] sm:$0xff] %v1060_v47  ;;  %v1483_v50 = vpop.f32.mrb[8].mxu0 }
 0x114   : > { %v1484_v51 = vpop.f32.mrb[9].mxu0 }
 0x115   : > { %v1485_v53 = vadd.f32 %v1484_v51, %v1483_v50  ;;  %v1486_v54 = vpop.f32.mrb[10].mxu0 }
 0x116   : > { %v1064_v52 = vpop.f32.mrb[4].mxu1  ;;  %v1487_v58 = vpop.f32.mrb[11].mxu0 }
 0x117   : > { %v1065_v55 = vadd.f32 %v1064_v52, %v904_v49  ;;  %v1066_v56 = vpop.f32.mrb[5].mxu1  ;;  %v1488_v60 = vadd.f32 %v1487_v58, %v1486_v54  ;;  %v912_v63 = vadd.f32 %v1485_v53, %v2089_v34 }
 0x118   : > { %v1067_v59 = vpop.f32.mrb[6].mxu1 }
 0x119   : > { %1185 = vst [vmem:[%s2095_s29 + $0x10] sm:$0xff] %v1065_v55  ;;  %v1068_v61 = vadd.f32 %v1067_v59, %v907_v57  ;;  %v1069_v62 = vpop.f32.mrb[7].mxu1  ;;  %v915_v7 = vadd.f32 %v1488_v60, %v2089_v34 }
 0x11b   : > { %1186 = vst [vmem:[%s2095_s29 + $0x18] sm:$0xff] %v1068_v61  ;;  %v1489_v0 = vpop.f32.mrb[12].mxu0 }
 0x11c   : > { %v1490_v1 = vpop.f32.mrb[13].mxu0 }
 0x11d   : > { %v1491_v3 = vadd.f32 %v1490_v1, %v1489_v0  ;;  %v1492_v4 = vpop.f32.mrb[14].mxu0 }
 0x11e   : > { %v1072_v2 = vpop.f32.mrb[8].mxu1  ;;  %v1493_v8 = vpop.f32.mrb[15].mxu0 }
 0x11f   : > { %v1073_v5 = vadd.f32 %v1072_v2, %v912_v63  ;;  %v1074_v6 = vpop.f32.mrb[9].mxu1  ;;  %v1494_v10 = vadd.f32 %v1493_v8, %v1492_v4  ;;  %v920_v13 = vadd.f32 %v1491_v3, %v2089_v34 }
 0x120   : > { %v1075_v9 = vpop.f32.mrb[10].mxu1 }
 0x121   : > { %1187 = vst [vmem:[%s2095_s29 + $0x20] sm:$0xff] %v1073_v5  ;;  %v1076_v11 = vadd.f32 %v1075_v9, %v915_v7  ;;  %v1077_v12 = vpop.f32.mrb[11].mxu1  ;;  %v923_v21 = vadd.f32 %v1494_v10, %v2089_v34 }
 0x123   : > { %1188 = vst [vmem:[%s2095_s29 + $0x28] sm:$0xff] %v1076_v11  ;;  %v1495_v14 = vpop.f32.mrb[16].mxu0 }
 0x124   : > { %v1496_v15 = vpop.f32.mrb[17].mxu0 }
 0x125   : > { %v1497_v17 = vadd.f32 %v1496_v15, %v1495_v14  ;;  %v1498_v18 = vpop.f32.mrb[18].mxu0 }
 0x126   : > { %v1080_v16 = vpop.f32.mrb[12].mxu1  ;;  %v1499_v22 = vpop.f32.mrb[19].mxu0 }
 0x127   : > { %v1081_v19 = vadd.f32 %v1080_v16, %v920_v13  ;;  %v1082_v20 = vpop.f32.mrb[13].mxu1  ;;  %v1500_v24 = vadd.f32 %v1499_v22, %v1498_v18  ;;  %v928_v27 = vadd.f32 %v1497_v17, %v2089_v34 }
 0x128   : > { %v1083_v23 = vpop.f32.mrb[14].mxu1 }
 0x129   : > { %1189 = vst [vmem:[%s2095_s29 + $0x30] sm:$0xff] %v1081_v19  ;;  %v1084_v25 = vadd.f32 %v1083_v23, %v923_v21  ;;  %v1085_v26 = vpop.f32.mrb[15].mxu1  ;;  %v931_v36 = vadd.f32 %v1500_v24, %v2089_v34 }
 0x12b   : > { %1190 = vst [vmem:[%s2095_s29 + $0x38] sm:$0xff] %v1084_v25  ;;  %v1501_v28 = vpop.f32.mrb[20].mxu0 }
 0x12c   : > { %v1502_v29 = vpop.f32.mrb[21].mxu0 }
 0x12d   : > { %v1503_v31 = vadd.f32 %v1502_v29, %v1501_v28  ;;  %v1504_v32 = vpop.f32.mrb[22].mxu0 }
 0x12e   : > { %v1088_v30 = vpop.f32.mrb[16].mxu1  ;;  %v1505_v37 = vpop.f32.mrb[23].mxu0 }
 0x12f   : > { %v1089_v33 = vadd.f32 %v1088_v30, %v928_v27  ;;  %v1090_v35 = vpop.f32.mrb[17].mxu1  ;;  %v1506_v39 = vadd.f32 %v1505_v37, %v1504_v32  ;;  %v936_v42 = vadd.f32 %v1503_v31, %v2089_v34 }
 0x130   : > { %v1091_v38 = vpop.f32.mrb[18].mxu1 }
 0x131   : > { %1191 = vst [vmem:[%s2095_s29 + $0x40] sm:$0xff] %v1089_v33  ;;  %v1092_v40 = vadd.f32 %v1091_v38, %v931_v36  ;;  %v1093_v41 = vpop.f32.mrb[19].mxu1  ;;  %v939_v50 = vadd.f32 %v1506_v39, %v2089_v34 }
 0x133   : > { %1192 = vst [vmem:[%s2095_s29 + $0x48] sm:$0xff] %v1092_v40  ;;  %v1507_v43 = vpop.f32.mrb[24].mxu0 }
 0x134   : > { %v1508_v44 = vpop.f32.mrb[25].mxu0 }
 0x135   : > { %v1509_v46 = vadd.f32 %v1508_v44, %v1507_v43  ;;  %v1510_v47 = vpop.f32.mrb[26].mxu0 }
 0x136   : > { %v1096_v45 = vpop.f32.mrb[20].mxu1  ;;  %v1511_v51 = vpop.f32.mrb[27].mxu0 }
 0x137   : > { %v1097_v48 = vadd.f32 %v1096_v45, %v936_v42  ;;  %v1098_v49 = vpop.f32.mrb[21].mxu1  ;;  %v1512_v53 = vadd.f32 %v1511_v51, %v1510_v47  ;;  %v944_v56 = vadd.f32 %v1509_v46, %v2089_v34 }
 0x138   : > { %v1099_v52 = vpop.f32.mrb[22].mxu1 }
 0x139   : > { %1193 = vst [vmem:[%s2095_s29 + $0x50] sm:$0xff] %v1097_v48  ;;  %v1100_v54 = vadd.f32 %v1099_v52, %v939_v50  ;;  %v1101_v55 = vpop.f32.mrb[23].mxu1  ;;  %v947_v0 = vadd.f32 %v1512_v53, %v2089_v34 }
 0x13b   : > { %1194 = vst [vmem:[%s2095_s29 + $0x58] sm:$0xff] %v1100_v54  ;;  %v1513_v57 = vpop.f32.mrb[28].mxu0 }
 0x13c   : > { %v1514_v58 = vpop.f32.mrb[29].mxu0 }
 0x13d   : > { %v1515_v60 = vadd.f32 %v1514_v58, %v1513_v57  ;;  %v1516_v61 = vpop.f32.mrb[30].mxu0 }
 0x13e   : > { %v1104_v59 = vpop.f32.mrb[24].mxu1  ;;  %v1517_v1 = vpop.f32.mrb[31].mxu0 }
 0x13f   : > { %v1105_v62 = vadd.f32 %v1104_v59, %v944_v56  ;;  %v1106_v63 = vpop.f32.mrb[25].mxu1  ;;  %v1518_v3 = vadd.f32 %v1517_v1, %v1516_v61  ;;  %v952_v6 = vadd.f32 %v1515_v60, %v2089_v34 }
 0x140   : > { %v1107_v2 = vpop.f32.mrb[26].mxu1 }
 0x141   : > { %1195 = vst [vmem:[%s2095_s29 + $0x60] sm:$0xff] %v1105_v62  ;;  %v1108_v4 = vadd.f32 %v1107_v2, %v947_v0  ;;  %v1109_v5 = vpop.f32.mrb[27].mxu1  ;;  %v955_v14 = vadd.f32 %v1518_v3, %v2089_v34 }
 0x143   : > { %1196 = vst [vmem:[%s2095_s29 + $0x68] sm:$0xff] %v1108_v4  ;;  %v1519_v7 = vpop.f32.mrb[32].mxu0 }
 0x144   : > { %v1520_v8 = vpop.f32.mrb[33].mxu0 }
 0x145   : > { %v1521_v10 = vadd.f32 %v1520_v8, %v1519_v7  ;;  %v1522_v11 = vpop.f32.mrb[34].mxu0 }
 0x146   : > { %v1112_v9 = vpop.f32.mrb[28].mxu1  ;;  %v1523_v15 = vpop.f32.mrb[35].mxu0 }
 0x147   : > { %v1113_v12 = vadd.f32 %v1112_v9, %v952_v6  ;;  %v1114_v13 = vpop.f32.mrb[29].mxu1  ;;  %v1524_v17 = vadd.f32 %v1523_v15, %v1522_v11  ;;  %v960_v20 = vadd.f32 %v1521_v10, %v2089_v34 }
 0x148   : > { %v1115_v16 = vpop.f32.mrb[30].mxu1 }
 0x149   : > { %1197 = vst [vmem:[%s2095_s29 + $0x70] sm:$0xff] %v1113_v12  ;;  %v1116_v18 = vadd.f32 %v1115_v16, %v955_v14  ;;  %v1117_v19 = vpop.f32.mrb[31].mxu1  ;;  %v963_v28 = vadd.f32 %v1524_v17, %v2089_v34 }
 0x14b   : > { %1198 = vst [vmem:[%s2095_s29 + $0x78] sm:$0xff] %v1116_v18  ;;  %v1525_v21 = vpop.f32.mrb[36].mxu0 }
 0x14c   : > { %v1526_v22 = vpop.f32.mrb[37].mxu0 }
 0x14d   : > { %v1527_v24 = vadd.f32 %v1526_v22, %v1525_v21  ;;  %v1528_v25 = vpop.f32.mrb[38].mxu0 }
 0x14e   : > { %v1120_v23 = vpop.f32.mrb[32].mxu1  ;;  %v1529_v29 = vpop.f32.mrb[39].mxu0 }
 0x14f   : > { %v1121_v26 = vadd.f32 %v1120_v23, %v960_v20  ;;  %v1122_v27 = vpop.f32.mrb[33].mxu1  ;;  %v1530_v31 = vadd.f32 %v1529_v29, %v1528_v25  ;;  %v968_v35 = vadd.f32 %v1527_v24, %v2089_v34 }
 0x150   : > { %v1123_v30 = vpop.f32.mrb[34].mxu1 }
 0x151   : > { %1199 = vst [vmem:[%s2095_s29 + $0x80] sm:$0xff] %v1121_v26  ;;  %v1124_v32 = vadd.f32 %v1123_v30, %v963_v28  ;;  %v1125_v33 = vpop.f32.mrb[35].mxu1  ;;  %v971_v43 = vadd.f32 %v1530_v31, %v2089_v34 }
 0x153   : > { %1200 = vst [vmem:[%s2095_s29 + $0x88] sm:$0xff] %v1124_v32  ;;  %v1531_v36 = vpop.f32.mrb[40].mxu0 }
 0x154   : > { %v1532_v37 = vpop.f32.mrb[41].mxu0 }
 0x155   : > { %v1533_v39 = vadd.f32 %v1532_v37, %v1531_v36  ;;  %v1534_v40 = vpop.f32.mrb[42].mxu0 }
 0x156   : > { %v1128_v38 = vpop.f32.mrb[36].mxu1  ;;  %v1535_v44 = vpop.f32.mrb[43].mxu0 }
 0x157   : > { %v1129_v41 = vadd.f32 %v1128_v38, %v968_v35  ;;  %v1130_v42 = vpop.f32.mrb[37].mxu1  ;;  %v1536_v46 = vadd.f32 %v1535_v44, %v1534_v40  ;;  %v976_v49 = vadd.f32 %v1533_v39, %v2089_v34 }
 0x158   : > { %v1131_v45 = vpop.f32.mrb[38].mxu1 }
 0x159   : > { %1201 = vst [vmem:[%s2095_s29 + $0x90] sm:$0xff] %v1129_v41  ;;  %v1132_v47 = vadd.f32 %v1131_v45, %v971_v43  ;;  %v1133_v48 = vpop.f32.mrb[39].mxu1  ;;  %v979_v57 = vadd.f32 %v1536_v46, %v2089_v34 }
 0x15b   : > { %1202 = vst [vmem:[%s2095_s29 + $0x98] sm:$0xff] %v1132_v47  ;;  %v1537_v50 = vpop.f32.mrb[44].mxu0 }
 0x15c   : > { %v1538_v51 = vpop.f32.mrb[45].mxu0 }
 0x15d   : > { %v1539_v53 = vadd.f32 %v1538_v51, %v1537_v50  ;;  %v1540_v54 = vpop.f32.mrb[46].mxu0 }
 0x15e   : > { %v1136_v52 = vpop.f32.mrb[40].mxu1  ;;  %v1541_v58 = vpop.f32.mrb[47].mxu0 }
 0x15f   : > { %v1137_v55 = vadd.f32 %v1136_v52, %v976_v49  ;;  %v1138_v56 = vpop.f32.mrb[41].mxu1  ;;  %v1542_v60 = vadd.f32 %v1541_v58, %v1540_v54  ;;  %v984_v63 = vadd.f32 %v1539_v53, %v2089_v34 }
 0x160   : > { %v1139_v59 = vpop.f32.mrb[42].mxu1 }
 0x161   : > { %1203 = vst [vmem:[%s2095_s29 + $0xa0] sm:$0xff] %v1137_v55  ;;  %v1140_v61 = vadd.f32 %v1139_v59, %v979_v57  ;;  %v1141_v62 = vpop.f32.mrb[43].mxu1  ;;  %v987_v7 = vadd.f32 %v1542_v60, %v2089_v34 }
 0x163   : > { %1204 = vst [vmem:[%s2095_s29 + $0xa8] sm:$0xff] %v1140_v61  ;;  %v1543_v0 = vpop.f32.mrb[48].mxu0 }
 0x164   : > { %v1544_v1 = vpop.f32.mrb[49].mxu0 }
 0x165   : > { %v1545_v3 = vadd.f32 %v1544_v1, %v1543_v0  ;;  %v1546_v4 = vpop.f32.mrb[50].mxu0 }
 0x166   : > { %v1144_v2 = vpop.f32.mrb[44].mxu1  ;;  %v1547_v8 = vpop.f32.mrb[51].mxu0 }
 0x167   : > { %v1145_v5 = vadd.f32 %v1144_v2, %v984_v63  ;;  %v1146_v6 = vpop.f32.mrb[45].mxu1  ;;  %v1548_v10 = vadd.f32 %v1547_v8, %v1546_v4  ;;  %v992_v13 = vadd.f32 %v1545_v3, %v2089_v34 }
 0x168   : > { %v1147_v9 = vpop.f32.mrb[46].mxu1 }
 0x169   : > { %1205 = vst [vmem:[%s2095_s29 + $0xb0] sm:$0xff] %v1145_v5  ;;  %v1148_v11 = vadd.f32 %v1147_v9, %v987_v7  ;;  %v1149_v12 = vpop.f32.mrb[47].mxu1  ;;  %v995_v21 = vadd.f32 %v1548_v10, %v2089_v34 }
 0x16b   : > { %1206 = vst [vmem:[%s2095_s29 + $0xb8] sm:$0xff] %v1148_v11  ;;  %v1549_v14 = vpop.f32.mrb[52].mxu0 }
 0x16c   : > { %v1550_v15 = vpop.f32.mrb[53].mxu0 }
 0x16d   : > { %v1551_v17 = vadd.f32 %v1550_v15, %v1549_v14  ;;  %v1552_v18 = vpop.f32.mrb[54].mxu0 }
 0x16e   : > { %v1152_v16 = vpop.f32.mrb[48].mxu1  ;;  %v1553_v22 = vpop.f32.mrb[55].mxu0 }
 0x16f   : > { %v1153_v19 = vadd.f32 %v1152_v16, %v992_v13  ;;  %v1154_v20 = vpop.f32.mrb[49].mxu1  ;;  %v1554_v24 = vadd.f32 %v1553_v22, %v1552_v18  ;;  %v1000_v27 = vadd.f32 %v1551_v17, %v2089_v34 }
 0x170   : > { %v1155_v23 = vpop.f32.mrb[50].mxu1 }
 0x171   : > { %1207 = vst [vmem:[%s2095_s29 + $0xc0] sm:$0xff] %v1153_v19  ;;  %v1156_v25 = vadd.f32 %v1155_v23, %v995_v21  ;;  %v1157_v26 = vpop.f32.mrb[51].mxu1  ;;  %v1003_v36 = vadd.f32 %v1554_v24, %v2089_v34 }
 0x173   : > { %1208 = vst [vmem:[%s2095_s29 + $0xc8] sm:$0xff] %v1156_v25  ;;  %v1555_v28 = vpop.f32.mrb[56].mxu0 }
 0x174   : > { %v1556_v29 = vpop.f32.mrb[57].mxu0 }
 0x175   : > { %v1557_v31 = vadd.f32 %v1556_v29, %v1555_v28  ;;  %v1558_v32 = vpop.f32.mrb[58].mxu0 }
 0x176   : > { %v1160_v30 = vpop.f32.mrb[52].mxu1  ;;  %v1559_v37 = vpop.f32.mrb[59].mxu0 }
 0x177   : > { %v1161_v33 = vadd.f32 %v1160_v30, %v1000_v27  ;;  %v1162_v35 = vpop.f32.mrb[53].mxu1  ;;  %v1560_v39 = vadd.f32 %v1559_v37, %v1558_v32  ;;  %v1008_v42 = vadd.f32 %v1557_v31, %v2089_v34 }
 0x178   : > { %v1163_v38 = vpop.f32.mrb[54].mxu1 }
 0x179   : > { %1209 = vst [vmem:[%s2095_s29 + $0xd0] sm:$0xff] %v1161_v33  ;;  %v1164_v40 = vadd.f32 %v1163_v38, %v1003_v36  ;;  %v1165_v41 = vpop.f32.mrb[55].mxu1  ;;  %v1011_v50 = vadd.f32 %v1560_v39, %v2089_v34 }
 0x17b   : > { %1210 = vst [vmem:[%s2095_s29 + $0xd8] sm:$0xff] %v1164_v40  ;;  %v1561_v43 = vpop.f32.mrb[60].mxu0 }
 0x17c   : > { %v1562_v44 = vpop.f32.mrb[61].mxu0 }
 0x17d   : > { %v1563_v46 = vadd.f32 %v1562_v44, %v1561_v43  ;;  %v1564_v47 = vpop.f32.mrb[62].mxu0 }
 0x17e   : > { %v1168_v45 = vpop.f32.mrb[56].mxu1  ;;  %v1565_v51 = vpop.f32.mrb[63].mxu0 }
 0x17f   : > { %v1169_v48 = vadd.f32 %v1168_v45, %v1008_v42  ;;  %v1170_v49 = vpop.f32.mrb[57].mxu1  ;;  %v1566_v53 = vadd.f32 %v1565_v51, %v1564_v47  ;;  %v1016_v56 = vadd.f32 %v1563_v46, %v2089_v34 }
 0x180   : > { %v1171_v52 = vpop.f32.mrb[58].mxu1 }
 0x181   : > { %1211 = vst [vmem:[%s2095_s29 + $0xe0] sm:$0xff] %v1169_v48  ;;  %v1172_v54 = vadd.f32 %v1171_v52, %v1011_v50  ;;  %v1173_v55 = vpop.f32.mrb[59].mxu1  ;;  %v1019_v60 = vadd.f32 %v1566_v53, %v2089_v34 }
 0x183   : > { %1212 = vst [vmem:[%s2095_s29 + $0xe8] sm:$0xff] %v1172_v54 }
 0x186   : > { %v1176_v57 = vpop.f32.mrb[60].mxu1 }
 0x187   : > { %v1177_v58 = vadd.f32 %v1176_v57, %v1016_v56  ;;  %v1178_v59 = vpop.f32.mrb[61].mxu1 }
 0x188   : > { %v1179_v61 = vpop.f32.mrb[62].mxu1 }
 0x189   : > { %1213 = vst [vmem:[%s2095_s29 + $0xf0] sm:$0xff] %v1177_v58  ;;  %v1180_v62 = vadd.f32 %v1179_v61, %v1019_v60  ;;  %v1181_v63 = vpop.f32.mrb[63].mxu1 }
 0x18b   : > { %1214 = vst [vmem:[%s2095_s29 + $0xf8] sm:$0xff] %v1180_v62 }
 0x18c   : > { %1761 = shalt.err (!%p1758_p5)
}
 0x18d   : > { %s1762_s5 = scalar_lea.hbm %s2162_s26, 4096  ;;  %s1766_s8 = scalar_lea.hbm %s2219_s3, 8192 }
 0x18e   : > { %p1763_p6 = scmp.ne.s32.totalorder %s2162_s26, %s1762_s5  ;;  %p1767_p10 = scmp.lt.u32.totalorder %s2162_s26, %s2219_s3 }
 0x18f   : > { %p1768_p11 = scmp.lt.u32.totalorder %s1766_s8, %s1762_s5  ;;  %p1770_p13 = scmp.lt.u32.totalorder %s1762_s5, %s2162_s26 }
 0x190   : > { %p1764_p7 = pnand %p1763_p6, %p1892_p4 }
 0x191   : > { %p1769_p12 = por %p1768_p11, %p1767_p10 }
 0x192   : > { %p1765_p9 = pneg %p1764_p7 }
 0x193   : > { %p1771_p0 = por %p1770_p13, %p1769_p12 }
 0x195   : > { %p1772_p1 = pnand %p1771_p0, %p1765_p9 }
 0x197   : > { %1775 = shalt.err (!%p1772_p1)
}
 0x198   : > { %s1830_s11 = smov 128   ;;  %s1831_s29 = smov 8  }
 0x199   : > { %1567 = dma.vmem_to_hbm [thread:$0]  (%p1892_p4), %s2164_s19, 4096, %s2162_s26, %s2170_s15, %s1830_s11, %s1830_s11, %s1831_s29  }
 0x19a PF: > { %p1573_p2 = scmp.ge.s32.totalorder %s1826_s17, 2  ;;  %s1245_s18 = sand.u32 1, %s1806_s12  }
 0x19b   : > { %s1246_s21 = scalar_lea.sflag [#allocation3], %s1245_s18 }
 0x19c   : > { %p1570_p3 = pnand %p1573_p2, %p1899_p8 }
 0x19e   : > { %1801 = dma.done.wait (!%p1570_p3), %s1246_s21, 4096  }
 0x19f   : > { %1803 = vsyncadd (!%p1570_p3), %s1246_s21, 4294963200  ;;  %s16_s17 = sadd.s32 1, %s1826_s17   ;;  %s2222_s12 = smov %s1810_s13 }
 0x1a0   : > { %p13_p5 = scmp.ge.s32.totalorder %s16_s17, 4   ;;  %s2223_s13 = smov %s1814_s14 }
 0x1a1   : > { %s2224_s14 = smov %s1905_s25  ;;  %s2225_s15 = smov %s1822_s16 }
 0x1a2   : > { %s2226_s16 = smov %s2228_s20  ;;  %15 = sbr.rel (!%p13_p5) target bundleno = 4 (0x4), region = 73 }
 0x1a9   :  { %1251 = vsyncpa [#allocation3], 1 }
 0x1aa   :  { %1253 = vsyncpa [#allocation3 + $0x1], 1 }

</bundles_post_ra>
